<compile_context>
chip_gen: v5e
topology: v5e:2x2
jax: 0.10.0
libtpu: 0.0.40
codegen_flags: <defaults>
</compile_context>

<pallas_src>
import functools

import jax
import jax.numpy as jnp
from jax.experimental import pallas as pl
from jax.experimental.pallas import tpu as pltpu


def _round_up(n, m):
    return ((n + m - 1) // m) * m


def _fused_mlp_kernel(*refs, relu_flags):
    """refs = (x_ref, w0_ref, b0_ref, ..., wN_ref, bN_ref, out_ref).

    x_ref : (blk, Din_p) f32 batch tile (cast to bf16 in-kernel)
    w_i   : (din_i, dout_i) bf16, VMEM-resident across batch tiles
    b_i   : (1, dout_i) f32
    out   : (blk, Dout_p) f32, lane-dense (Dout_p multiple of 128) logits slab
    """
    x_ref = refs[0]
    o_ref = refs[-1]
    wb_refs = refs[1:-1]
    n_layers = len(wb_refs) // 2

    # Per-tile f32 -> bf16 cast on the VPU (hidden behind the x DMA).
    h = x_ref[...].astype(jnp.bfloat16)
    for i in range(n_layers):
        w = wb_refs[2 * i][...]
        b = wb_refs[2 * i + 1][...]
        # MXU: bf16 x bf16 -> f32 accumulate; bias/ReLU epilogue stays f32.
        y = jnp.dot(h, w, preferred_element_type=jnp.float32) + b
        if relu_flags[i]:
            y = jnp.maximum(y, 0.0)
        if i + 1 < n_layers:
            h = y.astype(jnp.bfloat16)
        else:
            o_ref[...] = y.astype(o_ref.dtype)


def init_widthnet_params(hidden_sizes, key):
    """torch.nn.Linear-style init: uniform(-1/sqrt(fan_in), 1/sqrt(fan_in)), f32."""
    input_size = 32 * 32 * 3
    dims = [input_size] + list(hidden_sizes) + [10]
    params = []
    for li in range(len(dims) - 1):
        fan_in, fan_out = dims[li], dims[li + 1]
        key, wk, bk = jax.random.split(key, 3)
        bound = 1.0 / (fan_in ** 0.5)
        w = jax.random.uniform(wk, (fan_in, fan_out), jnp.float32, -bound, bound)
        b = jax.random.uniform(bk, (fan_out,), jnp.float32, -bound, bound)
        params.append((w, b))
    return params


def prepare_widthnet_params(params):
    """One-time pad/cast of params for the fused kernel (do NOT call per step).

    Feature dims are zero-padded to multiples of 128 (lane-dense), weights cast
    to bf16 (MXU feed), biases kept f32 (epilogue). Zero weight columns + zero
    bias keep every padded activation lane exactly zero, so results match the
    unpadded network.
    """
    prepared = []
    for (w, b) in params:
        fi, fo = w.shape
        fi_p, fo_p = _round_up(fi, 128), _round_up(fo, 128)
        w_p = jnp.pad(w.astype(jnp.bfloat16), ((0, fi_p - fi), (0, fo_p - fo)))
        b_p = jnp.pad(b.reshape(1, -1).astype(jnp.float32),
                      ((0, 0), (0, fo_p - fo)))
        prepared.append((w_p, b_p))
    return prepared


def _vmem_limit_bytes():
    try:
        cap = int(pltpu.get_tpu_info().vmem_capacity_bytes)
    except Exception:
        cap = 64 * 1024 * 1024  # assume the smallest (v7x per-core) if query fails
    # ~3/4 of physical: ~48 MiB on v7x (64 MiB), 96 MiB on v5e/v6e (128 MiB).
    return max(32 * 1024 * 1024, min((cap * 3) // 4, 96 * 1024 * 1024))


def widthnet_forward(x, prepared_params, hidden_sizes, *, n_classes=10, block_b=1024):
    """Fused forward pass of WidthNet (use_dropout=False, use_batchnorm=False).

    `prepared_params` must come from prepare_widthnet_params().
    """
    B = x.shape[0]
    # x.view(x.size(0), -1): metadata-only reshape, stays f32 in HBM (cast in-kernel).
    x2d = x.reshape(B, -1).astype(jnp.float32)

    din_p = prepared_params[0][0].shape[0]
    dout_p = prepared_params[-1][0].shape[1]
    if x2d.shape[1] != din_p:  # never triggers for 32*32*3 = 3072 (multiple of 128)
        x2d = jnp.pad(x2d, ((0, 0), (0, din_p - x2d.shape[1])))

    n_hidden = len(hidden_sizes)
    n_layers = len(prepared_params)
    # ReLU after hidden layer i only if i < len(hidden_sizes) - 1, exactly as in
    # the nn.Module (the last hidden layer has NO ReLU before the classifier).
    relu_flags = tuple(i < n_hidden - 1 for i in range(n_layers))

    vmem_limit = _vmem_limit_bytes()
    weight_bytes = sum(int(w.size) * w.dtype.itemsize + int(b.size) * b.dtype.itemsize
                       for (w, b) in prepared_params)

    # Batch tile: >= 128 (MXU/lane friendly), <= block_b, small enough that the
    # grid keeps >= 2 steps (v7x dual-TC), never larger than the batch itself.
    blk = min(block_b, max(128, _round_up(pl.cdiv(B, 2), 128)))
    blk = min(blk, B)

    def vmem_estimate(bm):
        x_tile = bm * din_p * x2d.dtype.itemsize   # f32 input tile
        o_tile = bm * dout_p * 4                   # f32 output tile
        return 2 * (x_tile + o_tile) + 2 * weight_bytes  # double-buffered

    while blk > 128 and vmem_estimate(blk) > vmem_limit:
        blk = max(128, _round_up(blk // 2, 128))
    if vmem_estimate(blk) > vmem_limit:
        # TODO(synk): K/N-tiled accumulator path for very wide hidden layers.
        raise ValueError("WidthNet layers too wide for VMEM-resident weights")

    kernel = functools.partial(_fused_mlp_kernel, relu_flags=relu_flags)

    flat_wb = []
    in_specs = [pl.BlockSpec((blk, din_p), lambda i: (i, 0))]
    for (w_p, b_p) in prepared_params:
        flat_wb.append(w_p)
        flat_wb.append(b_p)
        # Constant block index => weights/bias stay VMEM-resident across tiles.
        in_specs.append(pl.BlockSpec(w_p.shape, lambda i: (0, 0)))
        in_specs.append(pl.BlockSpec(b_p.shape, lambda i: (0, 0)))

    out = pl.pallas_call(
        kernel,
        out_shape=jax.ShapeDtypeStruct((B, dout_p), jnp.float32),
        grid=(pl.cdiv(B, blk),),
        in_specs=in_specs,
        out_specs=pl.BlockSpec((blk, dout_p), lambda i: (i, 0)),
        compiler_params=pltpu.CompilerParams(
            dimension_semantics=("parallel",),
            vmem_limit_bytes=vmem_limit,
        ),
    )(x2d, *flat_wb)

    return out[:, :n_classes]


def widthnet_reference(x, params, hidden_sizes):
    """Pure-JAX reference with the same bf16-feed / f32-accum arithmetic."""
    B = x.shape[0]
    h = x.reshape(B, -1)
    n_hidden = len(hidden_sizes)
    for i, (w, b) in enumerate(params):
        y = jnp.dot(h.astype(jnp.bfloat16), w.astype(jnp.bfloat16),
                    preferred_element_type=jnp.float32) + b
        if i < n_hidden - 1:  # ReLU only between hidden layers, as in the module
            y = jnp.maximum(y, 0.0)
        h = y
    return h


if __name__ == "__main__":
    key = jax.random.PRNGKey(0)
    hidden_sizes = (32, 16)  # small hidden widths for the smoke test

    key, xk, pk = jax.random.split(key, 3)
    # NCHW input like the PyTorch module expects: [B, 3, 32, 32]
    x = jax.random.normal(xk, (2, 3, 32, 32), jnp.float32)
    params = init_widthnet_params(hidden_sizes, pk)
    prepared = prepare_widthnet_params(params)  # one-time pad/cast (cached)

    out = jax.block_until_ready(widthnet_forward(x, prepared, hidden_sizes))
    ref = widthnet_reference(x, params, hidden_sizes)
    assert out.shape == (2, 10), out.shape
    assert jnp.allclose(out, ref, atol=2e-2, rtol=2e-2), "mismatch vs reference (B=2)"

    # Larger, ragged batch exercises the multi-tile pipelined path with a masked
    # partial last block (blk=256 -> grid=(2,), last tile has 44 valid rows).
    key, xk2 = jax.random.split(key)
    x2 = jax.random.normal(xk2, (300, 3, 32, 32), jnp.float32)
    out2 = jax.block_until_ready(widthnet_forward(x2, prepared, hidden_sizes))
    ref2 = widthnet_reference(x2, params, hidden_sizes)
    assert out2.shape == (300, 10), out2.shape
    assert jnp.allclose(out2, ref2, atol=2e-2, rtol=2e-2), "mismatch vs reference (B=300)"

    print("KERNEL_OK")
</pallas_src>

<mosaic_0001>
module attributes {stable_mosaic.version = 11 : i64} {
  func.func @_fused_mlp_kernel(%arg0: i32, %arg1: memref<2x3072xf32, #tpu.memory_space<vmem>>, %arg2: memref<3072x128xbf16, #tpu.memory_space<vmem>>, %arg3: memref<1x128xf32, #tpu.memory_space<vmem>>, %arg4: memref<128x128xbf16, #tpu.memory_space<vmem>>, %arg5: memref<1x128xf32, #tpu.memory_space<vmem>>, %arg6: memref<128x128xbf16, #tpu.memory_space<vmem>>, %arg7: memref<1x128xf32, #tpu.memory_space<vmem>>, %arg8: memref<2x128xf32, #tpu.memory_space<vmem>>) attributes {dimension_semantics = [#tpu.dimension_semantics<parallel>], iteration_bounds = array<i64: 1>, scalar_prefetch = 0 : i64, scratch_operands = 0 : i64, tpu.core_type = #tpu.core_type<tc>, window_params = [{transform_indices = @transform_0, window_bounds = array<i64: 2, 3072>}, {pipeline_mode = #tpu.pipeline_mode<synchronous>, transform_indices = @transform_1, window_bounds = array<i64: 3072, 128>}, {pipeline_mode = #tpu.pipeline_mode<synchronous>, transform_indices = @transform_2, window_bounds = array<i64: 1, 128>}, {pipeline_mode = #tpu.pipeline_mode<synchronous>, transform_indices = @transform_3, window_bounds = array<i64: 128, 128>}, {pipeline_mode = #tpu.pipeline_mode<synchronous>, transform_indices = @transform_4, window_bounds = array<i64: 1, 128>}, {pipeline_mode = #tpu.pipeline_mode<synchronous>, transform_indices = @transform_5, window_bounds = array<i64: 128, 128>}, {pipeline_mode = #tpu.pipeline_mode<synchronous>, transform_indices = @transform_6, window_bounds = array<i64: 1, 128>}, {transform_indices = @transform_7, window_bounds = array<i64: 2, 128>}]} {
    %c0 = arith.constant 0 : index
    %c0_0 = arith.constant 0 : index
    %0 = vector.load %arg1[%c0, %c0_0] : memref<2x3072xf32, #tpu.memory_space<vmem>>, vector<2x3072xf32>
    %1 = arith.truncf %0 : vector<2x3072xf32> to vector<2x3072xbf16>
    %c0_1 = arith.constant 0 : index
    %c0_2 = arith.constant 0 : index
    %2 = vector.load %arg2[%c0_1, %c0_2] : memref<3072x128xbf16, #tpu.memory_space<vmem>>, vector<3072x128xbf16>
    %c0_3 = arith.constant 0 : index
    %c0_4 = arith.constant 0 : index
    %3 = vector.load %arg3[%c0_3, %c0_4] : memref<1x128xf32, #tpu.memory_space<vmem>>, vector<1x128xf32>
    %cst = arith.constant dense<0.000000e+00> : vector<2x128xf32>
    %4 = tpu.matmul %1, %2, %cst {dimension_numbers = #tpu.dot_dimension_numbers<[1], [0], [0], [1], [0, 0, 1, 1], [], []>} : vector<2x3072xbf16>, vector<3072x128xbf16>, vector<2x128xf32> -> vector<2x128xf32>
    %5 = vector.broadcast %3 : vector<1x128xf32> to vector<2x128xf32>
    %6 = arith.addf %4, %5 : vector<2x128xf32>
    %cst_5 = arith.constant 0.000000e+00 : f32
    %7 = vector.broadcast %cst_5 : f32 to vector<2x128xf32>
    %8 = arith.maximumf %6, %7 : vector<2x128xf32>
    %9 = arith.truncf %8 : vector<2x128xf32> to vector<2x128xbf16>
    %c0_6 = arith.constant 0 : index
    %c0_7 = arith.constant 0 : index
    %10 = vector.load %arg4[%c0_6, %c0_7] : memref<128x128xbf16, #tpu.memory_space<vmem>>, vector<128x128xbf16>
    %c0_8 = arith.constant 0 : index
    %c0_9 = arith.constant 0 : index
    %11 = vector.load %arg5[%c0_8, %c0_9] : memref<1x128xf32, #tpu.memory_space<vmem>>, vector<1x128xf32>
    %cst_10 = arith.constant dense<0.000000e+00> : vector<2x128xf32>
    %12 = tpu.matmul %9, %10, %cst_10 {dimension_numbers = #tpu.dot_dimension_numbers<[1], [0], [0], [1], [0, 0, 1, 1], [], []>} : vector<2x128xbf16>, vector<128x128xbf16>, vector<2x128xf32> -> vector<2x128xf32>
    %13 = vector.broadcast %11 : vector<1x128xf32> to vector<2x128xf32>
    %14 = arith.addf %12, %13 : vector<2x128xf32>
    %15 = arith.truncf %14 : vector<2x128xf32> to vector<2x128xbf16>
    %c0_11 = arith.constant 0 : index
    %c0_12 = arith.constant 0 : index
    %16 = vector.load %arg6[%c0_11, %c0_12] : memref<128x128xbf16, #tpu.memory_space<vmem>>, vector<128x128xbf16>
    %c0_13 = arith.constant 0 : index
    %c0_14 = arith.constant 0 : index
    %17 = vector.load %arg7[%c0_13, %c0_14] : memref<1x128xf32, #tpu.memory_space<vmem>>, vector<1x128xf32>
    %cst_15 = arith.constant dense<0.000000e+00> : vector<2x128xf32>
    %18 = tpu.matmul %15, %16, %cst_15 {dimension_numbers = #tpu.dot_dimension_numbers<[1], [0], [0], [1], [0, 0, 1, 1], [], []>} : vector<2x128xbf16>, vector<128x128xbf16>, vector<2x128xf32> -> vector<2x128xf32>
    %19 = vector.broadcast %17 : vector<1x128xf32> to vector<2x128xf32>
    %20 = arith.addf %18, %19 : vector<2x128xf32>
    %c0_16 = arith.constant 0 : index
    %c0_17 = arith.constant 0 : index
    %21 = vector.load %arg8[%c0_16, %c0_17] : memref<2x128xf32, #tpu.memory_space<vmem>>, vector<2x128xf32>
    tpu.vector_store %arg8[%c0_16, %c0_17], %20 {strides = array<i32>} : memref<2x128xf32, #tpu.memory_space<vmem>>, vector<2x128xf32>,
    return
  }
  func.func @transform_0(%arg0: i32) -> (i32, i32) {
    %c0_i32 = arith.constant 0 : i32
    %c0_i32_0 = arith.constant 0 : i32
    return %arg0, %c0_i32 : i32, i32
  }
  func.func @transform_1(%arg0: i32) -> (i32, i32) {
    %c0_i32 = arith.constant 0 : i32
    %c0_i32_0 = arith.constant 0 : i32
    %c0_i32_1 = arith.constant 0 : i32
    return %c0_i32, %c0_i32_0 : i32, i32
  }
  func.func @transform_2(%arg0: i32) -> (i32, i32) {
    %c0_i32 = arith.constant 0 : i32
    %c0_i32_0 = arith.constant 0 : i32
    %c0_i32_1 = arith.constant 0 : i32
    return %c0_i32, %c0_i32_0 : i32, i32
  }
  func.func @transform_3(%arg0: i32) -> (i32, i32) {
    %c0_i32 = arith.constant 0 : i32
    %c0_i32_0 = arith.constant 0 : i32
    %c0_i32_1 = arith.constant 0 : i32
    return %c0_i32, %c0_i32_0 : i32, i32
  }
  func.func @transform_4(%arg0: i32) -> (i32, i32) {
    %c0_i32 = arith.constant 0 : i32
    %c0_i32_0 = arith.constant 0 : i32
    %c0_i32_1 = arith.constant 0 : i32
    return %c0_i32, %c0_i32_0 : i32, i32
  }
  func.func @transform_5(%arg0: i32) -> (i32, i32) {
    %c0_i32 = arith.constant 0 : i32
    %c0_i32_0 = arith.constant 0 : i32
    %c0_i32_1 = arith.constant 0 : i32
    return %c0_i32, %c0_i32_0 : i32, i32
  }
  func.func @transform_6(%arg0: i32) -> (i32, i32) {
    %c0_i32 = arith.constant 0 : i32
    %c0_i32_0 = arith.constant 0 : i32
    %c0_i32_1 = arith.constant 0 : i32
    return %c0_i32, %c0_i32_0 : i32, i32
  }
  func.func @transform_7(%arg0: i32) -> (i32, i32) {
    %c0_i32 = arith.constant 0 : i32
    %c0_i32_0 = arith.constant 0 : i32
    return %arg0, %c0_i32 : i32, i32
  }
}

</mosaic_0001>

<bundles_post_ra>
// kernel: tpu_custom_call.1
= control target key start
LH: loop header
LB: loop body
LE: loop exit
PB: predicated region body
PF: predicated region fallthrough
CT: control target
= control target key end

     0   :  { %12 = vsyncpa [#allocation3], 0  ;;  %s3513_s0 = inlined_call_operand.hbm [shape: f32[2,3072], index: 0, kind: input, shape index: {}]   ;;  %s3514_s1 = inlined_call_operand.hbm [shape: bf16[3072,128], index: 1, kind: input, shape index: {}]   ;;  %s3515_s2 = inlined_call_operand.vmem [shape: f32[1,128], index: 2, kind: input, shape index: {}]   ;;  %s3516_s3 = inlined_call_operand.hbm [shape: bf16[128,128], index: 3, kind: input, shape index: {}]   ;;  %s3517_s4 = inlined_call_operand.vmem [shape: f32[1,128], index: 4, kind: input, shape index: {}]   ;;  %s3518_s5 = inlined_call_operand.hbm [shape: bf16[128,128], index: 5, kind: input, shape index: {}]   ;;  %s3519_s6 = inlined_call_operand.vmem [shape: f32[1,128], index: 6, kind: input, shape index: {}]   ;;  %s3520_s7 = inlined_call_operand.hbm [shape: f32[2,128], index: 7, kind: output, shape index: {}]  }
   0x1   :  { %13 = vsyncpa [#allocation6], 0 }
   0x2   :  { %14 = vsyncpa [#allocation9], 0  ;;  %s31_s26 = sshll.u32 %s3514_s1, 4  ;;  %s32_s26 = int_to_ptr.hbm [resolvable:$true] %s31_s26 }
   0x3   :  { %15 = vsyncpa [#allocation4], 0  ;;  %s3394_s27 = smov [#allocation5]   ;;  %s21_s8 = sshll.u32 %s3513_s0, 4  ;;  %s22_s8 = int_to_ptr.hbm [resolvable:$true] %s21_s8 }
   0x4   :  { %s33_s28 = sshll.u32 %s3394_s27, 4  ;;  %s3395_s9 = smov 64   ;;  %s34_s28 = int_to_ptr.vmem [resolvable:$true] %s33_s28 }
   0x5   :  { %s3396_s10 = smov 4   ;;  %s3397_s11 = smov [#allocation2]  }
   0x6   :  { %39 = dma.hbm_to_vmem [thread:$0]  %s32_s26, 24576, %s34_s28, [#allocation6], %s3395_s9, %s3395_s9, %s3396_s10  }
   0x7   :  { %s23_s12 = sshll.u32 %s3397_s11, 4  ;;  %s46_s15 = sshll.u32 %s3516_s3, 4  ;;  %s24_s12 = int_to_ptr.vmem [resolvable:$true] %s23_s12  ;;  %s47_s15 = int_to_ptr.hbm [resolvable:$true] %s46_s15 }
   0x8   :  { %26 = dma.hbm_to_vmem [thread:$0]  %s22_s8, 768, %s24_s12, [#allocation3]  }
   0x9   :  { %s61_s17 = sshll.u32 %s3518_s5, 4  ;;  %s3398_s18 = smov [#allocation7]   ;;  %s62_s17 = int_to_ptr.hbm [resolvable:$true] %s61_s17 }
   0xa   :  { %s48_s19 = sshll.u32 %s3398_s18, 4  ;;  %s3399_s0 = smov [#allocation8]   ;;  %s49_s19 = int_to_ptr.vmem [resolvable:$true] %s48_s19 }
   0xb   :  { %54 = dma.hbm_to_vmem [thread:$0]  %s47_s15, 1024, %s49_s19, [#allocation6], %s3395_s9, %s3395_s9, %s3396_s10  }
   0xc   :  { %s63_s20 = sshll.u32 %s3399_s0, 4  ;;  %s64_s20 = int_to_ptr.vmem [resolvable:$true] %s63_s20 }
   0xd   :  { %69 = dma.hbm_to_vmem [thread:$0]  %s62_s17, 1024, %s64_s20, [#allocation9], %s3395_s9, %s3395_s9, %s3396_s10  }
   0xe   :  { %3386 = dma.done.wait [#allocation3], 768  }
   0xf   :  { %3387 = vsyncadd [#allocation3], 4294966528 }
  0x10   :  { %3388 = dma.done.wait [#allocation6], 25600  }
  0x11   :  { %3389 = vsyncadd [#allocation6], 4294941696 }
  0x12   :  { %3390 = dma.done.wait [#allocation9], 1024  }
  0x13   :  { %3391 = vsyncadd [#allocation9], 4294966272  ;;  %v3055_v0 = vld [vmem:[#allocation5 + $0x38] sm:$0xff]  ;;  %v3054_v4 = vld [vmem:[#allocation5 + $0x30] sm:$0xff]  ;;  %s3400_s24 = smov [#allocation10]   ;;  %s2204_s28 = sshll.u32 %s3520_s7, 4  ;;  %s2205_s28 = int_to_ptr.hbm [resolvable:$true] %s2204_s28 }
  0x14   :  { %v3063_v1 = vld [vmem:[#allocation5 + $0x78] sm:$0xff]  ;;  %1719 = vmatpush.bf16.msra.mxu0 %v3055_v0  ;;  %v3062_v5 = vld [vmem:[#allocation5 + $0x70] sm:$0xff]  ;;  %v3053_v8 = vld [vmem:[#allocation5 + $0x28] sm:$0xff]  ;;  %s2202_s25 = sshll.u32 %s3400_s24, 4  ;;  %s2203_s25 = int_to_ptr.vmem [resolvable:$true] %s2202_s25 }
  0x15   :  { %v3071_v2 = vld [vmem:[#allocation5 + $0xb8] sm:$0xff]  ;;  %1732 = vmatpush.bf16.msra.mxu1 %v3063_v1  ;;  %v3070_v6 = vld [vmem:[#allocation5 + $0xb0] sm:$0xff]  ;;  %v3061_v9 = vld [vmem:[#allocation5 + $0x68] sm:$0xff] }
  0x16   :  { %v3079_v3 = vld [vmem:[#allocation5 + $0xf8] sm:$0xff]  ;;  %1745 = vmatpush.bf16.msra.mxu2 %v3071_v2  ;;  %v3078_v7 = vld [vmem:[#allocation5 + $0xf0] sm:$0xff]  ;;  %v3069_v10 = vld [vmem:[#allocation5 + $0xa8] sm:$0xff] }
  0x17   :  { %1758 = vmatpush.bf16.msra.mxu3 %v3079_v3  ;;  %v3077_v11 = vld [vmem:[#allocation5 + $0xe8] sm:$0xff]  ;;  %v3052_v12 = vld [vmem:[#allocation5 + $0x20] sm:$0xff]  ;;  %v3051_v16 = vld [vmem:[#allocation5 + $0x18] sm:$0xff] }
  0x18   :  { %1720 = vmatpush.bf16.msra.mxu0 %v3054_v4  ;;  %v3060_v13 = vld [vmem:[#allocation5 + $0x60] sm:$0xff]  ;;  %v3059_v17 = vld [vmem:[#allocation5 + $0x58] sm:$0xff]  ;;  %v3050_v20 = vld [vmem:[#allocation5 + $0x10] sm:$0xff] }
  0x19   :  { %1733 = vmatpush.bf16.msra.mxu1 %v3062_v5  ;;  %v3068_v14 = vld [vmem:[#allocation5 + $0xa0] sm:$0xff]  ;;  %v3067_v18 = vld [vmem:[#allocation5 + $0x98] sm:$0xff]  ;;  %v3058_v21 = vld [vmem:[#allocation5 + $0x50] sm:$0xff] }
  0x1a   :  { %1746 = vmatpush.bf16.msra.mxu2 %v3070_v6  ;;  %v3076_v15 = vld [vmem:[#allocation5 + $0xe0] sm:$0xff]  ;;  %v3075_v19 = vld [vmem:[#allocation5 + $0xd8] sm:$0xff]  ;;  %v88_v22 = vld [vmem:[#allocation2] sm:$0xff] }
  0x1b   :  { %1759 = vmatpush.bf16.msra.mxu3 %v3078_v7  ;;  %100 = vst [vmem:[#allocation1] ss:$4 sm:$0xff] %v88_v22  ;;  %v3066_v23 = vld [vmem:[#allocation5 + $0x90] sm:$0xff]  ;;  %v3049_v25 = vld [vmem:[#allocation5 + $0x8] sm:$0xff]  ;;  %v3048_v29 = vld [vmem:[#allocation5] sm:$0xff] }
  0x1c   :  { %1721 = vmatpush.bf16.msra.mxu0 %v3053_v8  ;;  %v3074_v24 = vld [vmem:[#allocation5 + $0xd0] sm:$0xff]  ;;  %v3057_v26 = vld [vmem:[#allocation5 + $0x48] sm:$0xff]  ;;  %v3056_v30 = vld [vmem:[#allocation5 + $0x40] sm:$0xff] }
  0x1d   :  { %1734 = vmatpush.bf16.msra.mxu1 %v3061_v9  ;;  %v3065_v27 = vld [vmem:[#allocation5 + $0x88] sm:$0xff]  ;;  %v3064_v31 = vld [vmem:[#allocation5 + $0x80] sm:$0xff]  ;;  %v3087_v38 = vld [vmem:[#allocation5 + $0x138] sm:$0xff] }
  0x1e   :  { %1747 = vmatpush.bf16.msra.mxu2 %v3069_v10  ;;  %v3073_v28 = vld [vmem:[#allocation5 + $0xc8] sm:$0xff]  ;;  %v3072_v33 = vld [vmem:[#allocation5 + $0xc0] sm:$0xff]  ;;  %v3095_v39 = vld [vmem:[#allocation5 + $0x178] sm:$0xff] }
  0x1f   :  { %1760 = vmatpush.bf16.msra.mxu3 %v3077_v11  ;;  %v90_v35 = vld [vmem:[#allocation2 + $0x10] sm:$0xff]  ;;  %v3103_v40 = vld [vmem:[#allocation5 + $0x1b8] sm:$0xff]  ;;  %v3086_v47 = vld [vmem:[#allocation5 + $0x130] sm:$0xff] }
  0x20   :  { %1722 = vmatpush.bf16.msra.mxu0 %v3052_v12  ;;  %v3111_v41 = vld [vmem:[#allocation5 + $0x1f8] sm:$0xff]  ;;  %v3094_v48 = vld [vmem:[#allocation5 + $0x170] sm:$0xff]  ;;  %v3085_v51 = vld [vmem:[#allocation5 + $0x128] sm:$0xff] }
  0x21   :  { %1735 = vmatpush.bf16.msra.mxu1 %v3060_v13  ;;  %v89_v42 = vld [vmem:[#allocation2 + $0x8] sm:$0xff]  ;;  %v3102_v49 = vld [vmem:[#allocation5 + $0x1b0] sm:$0xff]  ;;  %v3093_v52 = vld [vmem:[#allocation5 + $0x168] sm:$0xff] }
  0x22   :  { %1748 = vmatpush.bf16.msra.mxu2 %v3068_v14  ;;  %v105_v32 = vld.sshfl [vmem:[#allocation1 + $0x10] sm:$0xff pattern:$0x73625140]  ;;  %v103_v34 = vld.sshfl [vmem:[#allocation1] sm:$0xff pattern:$0x73625140] }
  0x23   :  { %1761 = vmatpush.bf16.msra.mxu3 %v3076_v15  ;;  %v106_v36 = vld.sshfl [vmem:[#allocation1 + $0x18] sm:$0xff pattern:$0x73625140]  ;;  %v104_v37 = vld.sshfl [vmem:[#allocation1 + $0x8] sm:$0xff pattern:$0x73625140]  ;;  %v157_v43 = vpack.c.bf16 %v105_v32, %v105_v32  ;;  %v155_v44 = vpack.c.bf16 %v103_v34, %v103_v34 }
  0x24   :  { %1723 = vmatpush.bf16.msra.mxu0 %v3051_v16  ;;  %111 = vst [vmem:[#allocation1] ss:$4 sm:$0xff] %v90_v35  ;;  %v158_v45 = vpack.c.bf16 %v106_v36, %v106_v36  ;;  %v156_v46 = vpack.c.bf16 %v104_v37, %v104_v37  ;;  %v3110_v50 = vld [vmem:[#allocation5 + $0x1f0] sm:$0xff]  ;;  %v3101_v53 = vld [vmem:[#allocation5 + $0x1a8] sm:$0xff]  ;;  %v3084_v55 = vld [vmem:[#allocation5 + $0x120] sm:$0xff] }
  0x25   :  { %1736 = vmatpush.bf16.msra.mxu1 %v3059_v17  ;;  %102 = vst [vmem:[#allocation1 + $0x20] ss:$4 sm:$0xff] %v89_v42  ;;  %v3109_v54 = vld [vmem:[#allocation5 + $0x1e8] sm:$0xff]  ;;  %v3092_v57 = vld [vmem:[#allocation5 + $0x160] sm:$0xff]  ;;  %v3083_v0 = vld [vmem:[#allocation5 + $0x118] sm:$0xff] }
  0x26   :  { %1749 = vmatpush.bf16.msra.mxu2 %v3067_v18  ;;  %v91_v59 = vld [vmem:[#allocation2 + $0x18] sm:$0xff]  ;;  %v3100_v62 = vld [vmem:[#allocation5 + $0x1a0] sm:$0xff]  ;;  %v3091_v1 = vld [vmem:[#allocation5 + $0x158] sm:$0xff] }
  0x27   :  { %1762 = vmatpush.bf16.msra.mxu3 %v3075_v19  ;;  %v3108_v63 = vld [vmem:[#allocation5 + $0x1e0] sm:$0xff]  ;;  %v3099_v2 = vld [vmem:[#allocation5 + $0x198] sm:$0xff]  ;;  %v3082_v4 = vld [vmem:[#allocation5 + $0x110] sm:$0xff] }
  0x28   :  { %1724 = vmatpush.bf16.msra.mxu0 %v3050_v20  ;;  %v3107_v3 = vld [vmem:[#allocation5 + $0x1d8] sm:$0xff]  ;;  %v3090_v5 = vld [vmem:[#allocation5 + $0x150] sm:$0xff]  ;;  %v3081_v8 = vld [vmem:[#allocation5 + $0x108] sm:$0xff] }
  0x29   :  { %1737 = vmatpush.bf16.msra.mxu1 %v3058_v21  ;;  %v3098_v6 = vld [vmem:[#allocation5 + $0x190] sm:$0xff]  ;;  %v3089_v9 = vld [vmem:[#allocation5 + $0x148] sm:$0xff]  ;;  %v3080_v12 = vld [vmem:[#allocation5 + $0x100] sm:$0xff] }
  0x2a   :  { %1750 = vmatpush.bf16.msra.mxu2 %v3066_v23  ;;  %v3106_v7 = vld [vmem:[#allocation5 + $0x1d0] sm:$0xff]  ;;  %v3097_v10 = vld [vmem:[#allocation5 + $0x188] sm:$0xff]  ;;  %v3088_v13 = vld [vmem:[#allocation5 + $0x140] sm:$0xff] }
  0x2b   :  { %1763 = vmatpush.bf16.msra.mxu3 %v3074_v24  ;;  %v3105_v11 = vld [vmem:[#allocation5 + $0x1c8] sm:$0xff]  ;;  %v3096_v14 = vld [vmem:[#allocation5 + $0x180] sm:$0xff]  ;;  %v3119_v16 = vld [vmem:[#allocation5 + $0x238] sm:$0xff] }
  0x2c   :  { %1725 = vmatpush.bf16.msra.mxu0 %v3049_v25  ;;  %v3453_v56 = vld.sshfl [vmem:[#allocation1 + $0x30] sm:$0xff pattern:$0x73625140]  ;;  %v3455_v58 = vld.sshfl [vmem:[#allocation1 + $0x20] sm:$0xff pattern:$0x73625140] }
  0x2d   :  { %1738 = vmatpush.bf16.msra.mxu1 %v3057_v26  ;;  %v3457_v60 = vld.sshfl [vmem:[#allocation1 + $0x38] sm:$0xff pattern:$0x73625140]  ;;  %v3459_v61 = vld.sshfl [vmem:[#allocation1 + $0x28] sm:$0xff pattern:$0x73625140]  ;;  %v161_v21 = vpack.c.bf16 %v3453_v56, %v3453_v56  ;;  %v159_v22 = vpack.c.bf16 %v3455_v58, %v3455_v58 }
  0x2e   :  { %1751 = vmatpush.bf16.msra.mxu2 %v3065_v27  ;;  %112 = vst [vmem:[#allocation1 + $0x20] ss:$4 sm:$0xff] %v91_v59  ;;  %v3104_v15 = vld [vmem:[#allocation5 + $0x1c0] sm:$0xff]  ;;  %v3127_v17 = vld [vmem:[#allocation5 + $0x278] sm:$0xff]  ;;  %v3118_v20 = vld [vmem:[#allocation5 + $0x230] sm:$0xff]  ;;  %v162_v25 = vpack.c.bf16 %v3457_v60, %v3457_v60  ;;  %v160_v26 = vpack.c.bf16 %v3459_v61, %v3459_v61 }
  0x2f   :  { %1764 = vmatpush.bf16.msra.mxu3 %v3073_v28  ;;  %v3135_v18 = vld [vmem:[#allocation5 + $0x2b8] sm:$0xff]  ;;  %v3126_v23 = vld [vmem:[#allocation5 + $0x270] sm:$0xff]  ;;  %v3469_v27 = vld.sshfl [vmem:[#allocation1] sm:$0xff pattern:$0x73625140] }
  0x30   :  { %1726 = vmatpush.bf16.msra.mxu0 %v3048_v29  ;;  %v3143_v19 = vld [vmem:[#allocation5 + $0x2f8] sm:$0xff]  ;;  %v3134_v24 = vld [vmem:[#allocation5 + $0x2b0] sm:$0xff]  ;;  %v3475_v32 = vld.sshfl [vmem:[#allocation1 + $0x18] sm:$0xff pattern:$0x73625140]  ;;  %v163_v61 = vpack.c.bf16 %v3469_v27, %v3469_v27 }
  0x31   :  { %1739 = vmatpush.bf16.msra.mxu1 %v3056_v30  ;;  %v3471_v28 = vld.sshfl [vmem:[#allocation1 + $0x10] sm:$0xff pattern:$0x73625140]  ;;  %v3473_v29 = vld.sshfl [vmem:[#allocation1 + $0x8] sm:$0xff pattern:$0x73625140] }
  0x32   :  { %1752 = vmatpush.bf16.msra.mxu2 %v3064_v31  ;;  %v3142_v30 = vld [vmem:[#allocation5 + $0x2f0] sm:$0xff]  ;;  %v3125_v34 = vld [vmem:[#allocation5 + $0x268] sm:$0xff]  ;;  %v3116_v37 = vld [vmem:[#allocation5 + $0x220] sm:$0xff] }
  0x33   :  { %1765 = vmatpush.bf16.msra.mxu3 %v3072_v33  ;;  %1727 = vmatmul.bf16.vlgmr.msra.gmra.mxu0 %v155_v44  ;;  %v92_v31 = vld [vmem:[#allocation2 + $0x20] sm:$0xff]  ;;  %v3117_v33 = vld [vmem:[#allocation5 + $0x228] sm:$0xff]  ;;  %v3123_v42 = vld [vmem:[#allocation5 + $0x258] sm:$0xff] }
  0x34   :  { %1771 = vmatpush.bf16.msrb.mxu0 %v3087_v38  ;;  %1740 = vmatmul.bf16.vlgmr.msra.gmra.mxu1 %v156_v46  ;;  %121 = vst [vmem:[#allocation1] ss:$4 sm:$0xff] %v92_v31  ;;  %v3133_v35 = vld [vmem:[#allocation5 + $0x2a8] sm:$0xff]  ;;  %v3124_v38 = vld [vmem:[#allocation5 + $0x260] sm:$0xff]  ;;  %v3139_v44 = vld [vmem:[#allocation5 + $0x2d8] sm:$0xff] }
  0x35   :  { %1784 = vmatpush.bf16.msrb.mxu1 %v3095_v39  ;;  %1753 = vmatmul.bf16.vlgmr.msra.gmra.mxu2 %v157_v43  ;;  %v3141_v36 = vld [vmem:[#allocation5 + $0x2e8] sm:$0xff]  ;;  %v3132_v39 = vld [vmem:[#allocation5 + $0x2a0] sm:$0xff]  ;;  %v3131_v43 = vld [vmem:[#allocation5 + $0x298] sm:$0xff] }
  0x36   :  { %1797 = vmatpush.bf16.msrb.mxu2 %v3103_v40  ;;  %1766 = vmatmul.bf16.vlgmr.msra.gmra.mxu3 %v158_v45  ;;  %v3140_v40 = vld [vmem:[#allocation5 + $0x2e0] sm:$0xff]  ;;  %v3114_v45 = vld [vmem:[#allocation5 + $0x210] sm:$0xff]  ;;  %v3159_v58 = vld [vmem:[#allocation5 + $0x378] sm:$0xff] }
  0x37   :  { %1810 = vmatpush.bf16.msrb.mxu3 %v3111_v41  ;;  %v3115_v41 = vld [vmem:[#allocation5 + $0x218] sm:$0xff]  ;;  %v3122_v46 = vld [vmem:[#allocation5 + $0x250] sm:$0xff]  ;;  %v3136_v56 = vld [vmem:[#allocation5 + $0x2c0] sm:$0xff] }
  0x38   :  { %1772 = vmatpush.bf16.msrb.mxu0 %v3086_v47  ;;  %v3130_v47 = vld [vmem:[#allocation5 + $0x290] sm:$0xff]  ;;  %v3167_v59 = vld [vmem:[#allocation5 + $0x3b8] sm:$0xff]  ;;  %v3153_v27 = vld [vmem:[#allocation5 + $0x348] sm:$0xff] }
  0x39   :  { %1785 = vmatpush.bf16.msrb.mxu1 %v3094_v48  ;;  %v3138_v48 = vld [vmem:[#allocation5 + $0x2d0] sm:$0xff]  ;;  %v3175_v60 = vld [vmem:[#allocation5 + $0x3f8] sm:$0xff]  ;;  %v3152_v31 = vld [vmem:[#allocation5 + $0x340] sm:$0xff] }
  0x3a   :  { %1798 = vmatpush.bf16.msrb.mxu2 %v3102_v49  ;;  %v3113_v49 = vld [vmem:[#allocation5 + $0x208] sm:$0xff] }
  0x3b   :  { %1811 = vmatpush.bf16.msrb.mxu3 %v3110_v50  ;;  %v3121_v50 = vld [vmem:[#allocation5 + $0x248] sm:$0xff] }
  0x3c   :  { %1773 = vmatpush.bf16.msrb.mxu0 %v3085_v51  ;;  %v3129_v51 = vld [vmem:[#allocation5 + $0x288] sm:$0xff] }
  0x3d   :  { %1786 = vmatpush.bf16.msrb.mxu1 %v3093_v52  ;;  %v3137_v52 = vld [vmem:[#allocation5 + $0x2c8] sm:$0xff] }
  0x3e   :  { %1799 = vmatpush.bf16.msrb.mxu2 %v3101_v53  ;;  %v3112_v53 = vld [vmem:[#allocation5 + $0x200] sm:$0xff] }
  0x3f   :  { %1812 = vmatpush.bf16.msrb.mxu3 %v3109_v54  ;;  %v3120_v54 = vld [vmem:[#allocation5 + $0x240] sm:$0xff] }
  0x40   :  { %1774 = vmatpush.bf16.msrb.mxu0 %v3084_v55  ;;  %v3128_v55 = vld [vmem:[#allocation5 + $0x280] sm:$0xff] }
  0x41   :  { %1787 = vmatpush.bf16.msrb.mxu1 %v3092_v57  ;;  %v3151_v57 = vld [vmem:[#allocation5 + $0x338] sm:$0xff] }
  0x42   :  { %1800 = vmatpush.bf16.msrb.mxu2 %v3100_v62  ;;  %v165_v62 = vpack.c.bf16 %v3471_v28, %v3471_v28  ;;  %v3161_v28 = vld [vmem:[#allocation5 + $0x388] sm:$0xff] }
  0x43   :  { %1813 = vmatpush.bf16.msrb.mxu3 %v3108_v63  ;;  %v3150_v63 = vld [vmem:[#allocation5 + $0x330] sm:$0xff] }
  0x44   :  { %1775 = vmatpush.bf16.msrb.mxu0 %v3083_v0  ;;  %v164_v0 = vpack.c.bf16 %v3473_v29, %v3473_v29  ;;  %v3169_v29 = vld [vmem:[#allocation5 + $0x3c8] sm:$0xff] }
  0x45   :  { %1788 = vmatpush.bf16.msrb.mxu1 %v3091_v1  ;;  %v166_v1 = vpack.c.bf16 %v3475_v32, %v3475_v32  ;;  %v3160_v32 = vld [vmem:[#allocation5 + $0x380] sm:$0xff] }
  0x46   :  { %1801 = vmatpush.bf16.msrb.mxu2 %v3099_v2  ;;  %v3158_v2 = vld [vmem:[#allocation5 + $0x370] sm:$0xff] }
  0x47   :  { %1814 = vmatpush.bf16.msrb.mxu3 %v3107_v3  ;;  %v3166_v3 = vld [vmem:[#allocation5 + $0x3b0] sm:$0xff] }
  0x48   :  { %1776 = vmatpush.bf16.msrb.mxu0 %v3082_v4  ;;  %v3485_v4 = vld.sshfl [vmem:[#allocation1 + $0x20] sm:$0xff pattern:$0x73625140] }
  0x49   :  { %1789 = vmatpush.bf16.msrb.mxu1 %v3090_v5  ;;  %v3487_v5 = vld.sshfl [vmem:[#allocation1 + $0x30] sm:$0xff pattern:$0x73625140] }
  0x4a   :  { %1802 = vmatpush.bf16.msrb.mxu2 %v3098_v6  ;;  %v3489_v6 = vld.sshfl [vmem:[#allocation1 + $0x28] sm:$0xff pattern:$0x73625140] }
  0x4b   :  { %1815 = vmatpush.bf16.msrb.mxu3 %v3106_v7  ;;  %v3174_v7 = vld [vmem:[#allocation5 + $0x3f0] sm:$0xff] }
  0x4c   :  { %1777 = vmatpush.bf16.msrb.mxu0 %v3081_v8  ;;  %v93_v8 = vld [vmem:[#allocation2 + $0x28] sm:$0xff] }
  0x4d   :  { %1790 = vmatpush.bf16.msrb.mxu1 %v3089_v9  ;;  %v3491_v9 = vld.sshfl [vmem:[#allocation1 + $0x38] sm:$0xff pattern:$0x73625140] }
  0x4e   :  { %1803 = vmatpush.bf16.msrb.mxu2 %v3097_v10  ;;  %122 = vst [vmem:[#allocation1 + $0x20] ss:$4 sm:$0xff] %v93_v8  ;;  %v3149_v10 = vld [vmem:[#allocation5 + $0x328] sm:$0xff] }
  0x4f   :  { %1816 = vmatpush.bf16.msrb.mxu3 %v3105_v11  ;;  %v3157_v11 = vld [vmem:[#allocation5 + $0x368] sm:$0xff] }
  0x50   :  { %1778 = vmatpush.bf16.msrb.mxu0 %v3080_v12  ;;  %v3165_v12 = vld [vmem:[#allocation5 + $0x3a8] sm:$0xff] }
  0x51   :  { %1791 = vmatpush.bf16.msrb.mxu1 %v3088_v13  ;;  %v3173_v13 = vld [vmem:[#allocation5 + $0x3e8] sm:$0xff] }
  0x52   :  { %1804 = vmatpush.bf16.msrb.mxu2 %v3096_v14  ;;  %v3148_v14 = vld [vmem:[#allocation5 + $0x320] sm:$0xff]  ;;  %v123_v8 = vld.sshfl [vmem:[#allocation1] sm:$0xff pattern:$0x73625140] }
  0x53   :  { %1817 = vmatpush.bf16.msrb.mxu3 %v3104_v15  ;;  %1779 = vmatmul.bf16.vlgmr.msrb.gmra.mxu0 %v159_v22  ;;  %v3156_v15 = vld [vmem:[#allocation5 + $0x360] sm:$0xff]  ;;  %v3146_v22 = vld [vmem:[#allocation5 + $0x310] sm:$0xff] }
  0x54   :  { %1823 = vmatpush.bf16.msra.mxu0 %v3119_v16  ;;  %1792 = vmatmul.bf16.vlgmr.msrb.gmra.mxu1 %v160_v26  ;;  %v3164_v16 = vld [vmem:[#allocation5 + $0x3a0] sm:$0xff]  ;;  %v3145_v26 = vld [vmem:[#allocation5 + $0x308] sm:$0xff] }
  0x55   :  { %1836 = vmatpush.bf16.msra.mxu1 %v3127_v17  ;;  %1805 = vmatmul.bf16.vlgmr.msrb.gmra.mxu2 %v161_v21  ;;  %v3172_v17 = vld [vmem:[#allocation5 + $0x3e0] sm:$0xff]  ;;  %v3171_v21 = vld [vmem:[#allocation5 + $0x3d8] sm:$0xff] }
  0x56   :  { %1849 = vmatpush.bf16.msra.mxu2 %v3135_v18  ;;  %1818 = vmatmul.bf16.vlgmr.msrb.gmra.mxu3 %v162_v25  ;;  %v3147_v18 = vld [vmem:[#allocation5 + $0x318] sm:$0xff]  ;;  %v3170_v25 = vld [vmem:[#allocation5 + $0x3d0] sm:$0xff] }
  0x57   :  { %1862 = vmatpush.bf16.msra.mxu3 %v3143_v19  ;;  %v3155_v19 = vld [vmem:[#allocation5 + $0x358] sm:$0xff] }
  0x58   :  { %1824 = vmatpush.bf16.msra.mxu0 %v3118_v20  ;;  %v3163_v20 = vld [vmem:[#allocation5 + $0x398] sm:$0xff] }
  0x59   :  { %1837 = vmatpush.bf16.msra.mxu1 %v3126_v23  ;;  %v3154_v23 = vld [vmem:[#allocation5 + $0x350] sm:$0xff] }
  0x5a   :  { %1850 = vmatpush.bf16.msra.mxu2 %v3134_v24  ;;  %v3162_v24 = vld [vmem:[#allocation5 + $0x390] sm:$0xff] }
  0x5b   :  { %1863 = vmatpush.bf16.msra.mxu3 %v3142_v30  ;;  %v3144_v30 = vld [vmem:[#allocation5 + $0x300] sm:$0xff] }
  0x5c   :  { %1825 = vmatpush.bf16.msra.mxu0 %v3117_v33  ;;  %v3168_v33 = vld [vmem:[#allocation5 + $0x3c0] sm:$0xff] }
  0x5d   :  { %1838 = vmatpush.bf16.msra.mxu1 %v3125_v34  ;;  %v3183_v34 = vld [vmem:[#allocation5 + $0x438] sm:$0xff] }
  0x5e   :  { %1851 = vmatpush.bf16.msra.mxu2 %v3133_v35  ;;  %v3191_v35 = vld [vmem:[#allocation5 + $0x478] sm:$0xff] }
  0x5f   :  { %1864 = vmatpush.bf16.msra.mxu3 %v3141_v36  ;;  %v3199_v36 = vld [vmem:[#allocation5 + $0x4b8] sm:$0xff] }
  0x60   :  { %1826 = vmatpush.bf16.msra.mxu0 %v3116_v37  ;;  %v3207_v37 = vld [vmem:[#allocation5 + $0x4f8] sm:$0xff] }
  0x61   :  { %1839 = vmatpush.bf16.msra.mxu1 %v3124_v38  ;;  %v167_v38 = vpack.c.bf16 %v3485_v4, %v3485_v4  ;;  %v3192_v4 = vld [vmem:[#allocation5 + $0x480] sm:$0xff] }
  0x62   :  { %1852 = vmatpush.bf16.msra.mxu2 %v3132_v39  ;;  %v169_v39 = vpack.c.bf16 %v3487_v5, %v3487_v5  ;;  %v3200_v5 = vld [vmem:[#allocation5 + $0x4c0] sm:$0xff] }
  0x63   :  { %1865 = vmatpush.bf16.msra.mxu3 %v3140_v40  ;;  %v168_v40 = vpack.c.bf16 %v3489_v6, %v3489_v6  ;;  %v3215_v6 = vld [vmem:[#allocation5 + $0x538] sm:$0xff] }
  0x64   :  { %1827 = vmatpush.bf16.msra.mxu0 %v3115_v41  ;;  %v170_v41 = vpack.c.bf16 %v3491_v9, %v3491_v9  ;;  %v125_v9 = vld.sshfl [vmem:[#allocation1 + $0x10] sm:$0xff pattern:$0x73625140] }
  0x65   :  { %1840 = vmatpush.bf16.msra.mxu1 %v3123_v42  ;;  %v3182_v42 = vld [vmem:[#allocation5 + $0x430] sm:$0xff] }
  0x66   :  { %1853 = vmatpush.bf16.msra.mxu2 %v3131_v43  ;;  %v3190_v43 = vld [vmem:[#allocation5 + $0x470] sm:$0xff] }
  0x67   :  { %1866 = vmatpush.bf16.msra.mxu3 %v3139_v44  ;;  %v3198_v44 = vld [vmem:[#allocation5 + $0x4b0] sm:$0xff] }
  0x68   :  { %1828 = vmatpush.bf16.msra.mxu0 %v3114_v45  ;;  %v3206_v45 = vld [vmem:[#allocation5 + $0x4f0] sm:$0xff] }
  0x69   :  { %1841 = vmatpush.bf16.msra.mxu1 %v3122_v46  ;;  %v3181_v46 = vld [vmem:[#allocation5 + $0x428] sm:$0xff] }
  0x6a   :  { %1854 = vmatpush.bf16.msra.mxu2 %v3130_v47  ;;  %v3189_v47 = vld [vmem:[#allocation5 + $0x468] sm:$0xff] }
  0x6b   :  { %1867 = vmatpush.bf16.msra.mxu3 %v3138_v48  ;;  %v3197_v48 = vld [vmem:[#allocation5 + $0x4a8] sm:$0xff] }
  0x6c   :  { %1829 = vmatpush.bf16.msra.mxu0 %v3113_v49  ;;  %v3205_v49 = vld [vmem:[#allocation5 + $0x4e8] sm:$0xff] }
  0x6d   :  { %1842 = vmatpush.bf16.msra.mxu1 %v3121_v50  ;;  %v3180_v50 = vld [vmem:[#allocation5 + $0x420] sm:$0xff] }
  0x6e   :  { %1855 = vmatpush.bf16.msra.mxu2 %v3129_v51  ;;  %v3188_v51 = vld [vmem:[#allocation5 + $0x460] sm:$0xff] }
  0x6f   :  { %1868 = vmatpush.bf16.msra.mxu3 %v3137_v52  ;;  %v3196_v52 = vld [vmem:[#allocation5 + $0x4a0] sm:$0xff] }
  0x70   :  { %1830 = vmatpush.bf16.msra.mxu0 %v3112_v53  ;;  %v3204_v53 = vld [vmem:[#allocation5 + $0x4e0] sm:$0xff] }
  0x71   :  { %1843 = vmatpush.bf16.msra.mxu1 %v3120_v54  ;;  %v3179_v54 = vld [vmem:[#allocation5 + $0x418] sm:$0xff] }
  0x72   :  { %1856 = vmatpush.bf16.msra.mxu2 %v3128_v55  ;;  %v3187_v55 = vld [vmem:[#allocation5 + $0x458] sm:$0xff] }
  0x73   :  { %1869 = vmatpush.bf16.msra.mxu3 %v3136_v56  ;;  %1831 = vmatmul.bf16.vlgmr.msra.gmra.mxu0 %v163_v61  ;;  %v3195_v56 = vld [vmem:[#allocation5 + $0x498] sm:$0xff]  ;;  %v3202_v61 = vld [vmem:[#allocation5 + $0x4d0] sm:$0xff] }
  0x74   :  { %1875 = vmatpush.bf16.msrb.mxu0 %v3151_v57  ;;  %1844 = vmatmul.bf16.vlgmr.msra.gmra.mxu1 %v164_v0  ;;  %v3203_v57 = vld [vmem:[#allocation5 + $0x4d8] sm:$0xff]  ;;  %v3193_v0 = vld [vmem:[#allocation5 + $0x488] sm:$0xff] }
  0x75   :  { %1888 = vmatpush.bf16.msrb.mxu1 %v3159_v58  ;;  %1857 = vmatmul.bf16.vlgmr.msra.gmra.mxu2 %v165_v62  ;;  %v3178_v58 = vld [vmem:[#allocation5 + $0x410] sm:$0xff]  ;;  %v3177_v62 = vld [vmem:[#allocation5 + $0x408] sm:$0xff] }
  0x76   :  { %1901 = vmatpush.bf16.msrb.mxu2 %v3167_v59  ;;  %1870 = vmatmul.bf16.vlgmr.msra.gmra.mxu3 %v166_v1  ;;  %v3186_v59 = vld [vmem:[#allocation5 + $0x450] sm:$0xff]  ;;  %v3201_v1 = vld [vmem:[#allocation5 + $0x4c8] sm:$0xff] }
  0x77   :  { %1914 = vmatpush.bf16.msrb.mxu3 %v3175_v60  ;;  %v3194_v60 = vld [vmem:[#allocation5 + $0x490] sm:$0xff] }
  0x78   :  { %1876 = vmatpush.bf16.msrb.mxu0 %v3150_v63  ;;  %v3185_v63 = vld [vmem:[#allocation5 + $0x448] sm:$0xff] }
  0x79   :  { %1889 = vmatpush.bf16.msrb.mxu1 %v3158_v2  ;;  %v3176_v2 = vld [vmem:[#allocation5 + $0x400] sm:$0xff] }
  0x7a   :  { %1902 = vmatpush.bf16.msrb.mxu2 %v3166_v3  ;;  %v3184_v3 = vld [vmem:[#allocation5 + $0x440] sm:$0xff] }
  0x7b   :  { %1915 = vmatpush.bf16.msrb.mxu3 %v3174_v7  ;;  %v3223_v7 = vld [vmem:[#allocation5 + $0x578] sm:$0xff] }
  0x7c   :  { %1877 = vmatpush.bf16.msrb.mxu0 %v3149_v10  ;;  %v124_v10 = vld.sshfl [vmem:[#allocation1 + $0x8] sm:$0xff pattern:$0x73625140] }
  0x7d   :  { %1890 = vmatpush.bf16.msrb.mxu1 %v3157_v11  ;;  %v126_v11 = vld.sshfl [vmem:[#allocation1 + $0x18] sm:$0xff pattern:$0x73625140] }
  0x7e   :  { %1903 = vmatpush.bf16.msrb.mxu2 %v3165_v12  ;;  %v3231_v12 = vld [vmem:[#allocation5 + $0x5b8] sm:$0xff] }
  0x7f   :  { %1916 = vmatpush.bf16.msrb.mxu3 %v3173_v13  ;;  %v3239_v13 = vld [vmem:[#allocation5 + $0x5f8] sm:$0xff] }
  0x80   :  { %1878 = vmatpush.bf16.msrb.mxu0 %v3148_v14  ;;  %v171_v14 = vpack.c.bf16 %v123_v8, %v123_v8 }
  0x81   :  { %1891 = vmatpush.bf16.msrb.mxu1 %v3156_v15  ;;  %v173_v15 = vpack.c.bf16 %v125_v9, %v125_v9 }
  0x82   :  { %1904 = vmatpush.bf16.msrb.mxu2 %v3164_v16  ;;  %v172_v16 = vpack.c.bf16 %v124_v10, %v124_v10 }
  0x83   :  { %1917 = vmatpush.bf16.msrb.mxu3 %v3172_v17  ;;  %v174_v17 = vpack.c.bf16 %v126_v11, %v126_v11 }
  0x84   :  { %1879 = vmatpush.bf16.msrb.mxu0 %v3147_v18  ;;  %v3214_v18 = vld [vmem:[#allocation5 + $0x530] sm:$0xff] }
  0x85   :  { %1892 = vmatpush.bf16.msrb.mxu1 %v3155_v19  ;;  %v3222_v19 = vld [vmem:[#allocation5 + $0x570] sm:$0xff] }
  0x86   :  { %1905 = vmatpush.bf16.msrb.mxu2 %v3163_v20  ;;  %v3230_v20 = vld [vmem:[#allocation5 + $0x5b0] sm:$0xff] }
  0x87   :  { %1918 = vmatpush.bf16.msrb.mxu3 %v3171_v21  ;;  %v3238_v21 = vld [vmem:[#allocation5 + $0x5f0] sm:$0xff] }
  0x88   :  { %1880 = vmatpush.bf16.msrb.mxu0 %v3146_v22  ;;  %v3213_v22 = vld [vmem:[#allocation5 + $0x528] sm:$0xff] }
  0x89   :  { %1893 = vmatpush.bf16.msrb.mxu1 %v3154_v23  ;;  %v3221_v23 = vld [vmem:[#allocation5 + $0x568] sm:$0xff] }
  0x8a   :  { %1906 = vmatpush.bf16.msrb.mxu2 %v3162_v24  ;;  %v3263_v24 = vld [vmem:[%s3515_s2] ss:$0 sm:$0xff] }
  0x8b   :  { %1919 = vmatpush.bf16.msrb.mxu3 %v3170_v25  ;;  %v3229_v25 = vld [vmem:[#allocation5 + $0x5a8] sm:$0xff] }
  0x8c   :  { %1881 = vmatpush.bf16.msrb.mxu0 %v3145_v26  ;;  %v3237_v26 = vld [vmem:[#allocation5 + $0x5e8] sm:$0xff] }
  0x8d   :  { %1894 = vmatpush.bf16.msrb.mxu1 %v3153_v27 }
  0x8e   :  { %1907 = vmatpush.bf16.msrb.mxu2 %v3161_v28  ;;  %v3212_v28 = vld [vmem:[#allocation5 + $0x520] sm:$0xff] }
  0x8f   :  { %1920 = vmatpush.bf16.msrb.mxu3 %v3169_v29  ;;  %v3220_v29 = vld [vmem:[#allocation5 + $0x560] sm:$0xff] }
  0x90   :  { %1882 = vmatpush.bf16.msrb.mxu0 %v3144_v30 }
  0x91   :  { %1895 = vmatpush.bf16.msrb.mxu1 %v3152_v31 }
  0x92   :  { %1908 = vmatpush.bf16.msrb.mxu2 %v3160_v32  ;;  %v3228_v32 = vld [vmem:[#allocation5 + $0x5a0] sm:$0xff] }
  0x93   :  { %1921 = vmatpush.bf16.msrb.mxu3 %v3168_v33  ;;  %1883 = vmatmul.bf16.vlgmr.msrb.gmra.mxu0 %v167_v38  ;;  %v3236_v33 = vld [vmem:[#allocation5 + $0x5e0] sm:$0xff]  ;;  %v3235_v38 = vld [vmem:[#allocation5 + $0x5d8] sm:$0xff] }
  0x94   :  { %1927 = vmatpush.bf16.msra.mxu0 %v3183_v34  ;;  %1896 = vmatmul.bf16.vlgmr.msrb.gmra.mxu1 %v168_v40 }
  0x95   :  { %1940 = vmatpush.bf16.msra.mxu1 %v3191_v35  ;;  %1909 = vmatmul.bf16.vlgmr.msrb.gmra.mxu2 %v169_v39  ;;  %v3211_v35 = vld [vmem:[#allocation5 + $0x518] sm:$0xff] }
  0x96   :  { %1953 = vmatpush.bf16.msra.mxu2 %v3199_v36  ;;  %1922 = vmatmul.bf16.vlgmr.msrb.gmra.mxu3 %v170_v41  ;;  %v3219_v36 = vld [vmem:[#allocation5 + $0x558] sm:$0xff] }
  0x97   :  { %1966 = vmatpush.bf16.msra.mxu3 %v3207_v37  ;;  %v3227_v37 = vld [vmem:[#allocation5 + $0x598] sm:$0xff] }
  0x98   :  { %1928 = vmatpush.bf16.msra.mxu0 %v3182_v42 }
  0x99   :  { %1941 = vmatpush.bf16.msra.mxu1 %v3190_v43  ;;  %v3210_v43 = vld [vmem:[#allocation5 + $0x510] sm:$0xff] }
  0x9a   :  { %1954 = vmatpush.bf16.msra.mxu2 %v3198_v44  ;;  %v3218_v44 = vld [vmem:[#allocation5 + $0x550] sm:$0xff] }
  0x9b   :  { %1967 = vmatpush.bf16.msra.mxu3 %v3206_v45 }
  0x9c   :  { %1929 = vmatpush.bf16.msra.mxu0 %v3181_v46 }
  0x9d   :  { %1942 = vmatpush.bf16.msra.mxu1 %v3189_v47  ;;  %v3226_v47 = vld [vmem:[#allocation5 + $0x590] sm:$0xff] }
  0x9e   :  { %1955 = vmatpush.bf16.msra.mxu2 %v3197_v48  ;;  %v3234_v48 = vld [vmem:[#allocation5 + $0x5d0] sm:$0xff] }
  0x9f   :  { %1968 = vmatpush.bf16.msra.mxu3 %v3205_v49  ;;  %v3209_v49 = vld [vmem:[#allocation5 + $0x508] sm:$0xff] }
  0xa0   :  { %1930 = vmatpush.bf16.msra.mxu0 %v3180_v50  ;;  %v3217_v50 = vld [vmem:[#allocation5 + $0x548] sm:$0xff] }
  0xa1   :  { %1943 = vmatpush.bf16.msra.mxu1 %v3188_v51  ;;  %v3225_v51 = vld [vmem:[#allocation5 + $0x588] sm:$0xff] }
  0xa2   :  { %1956 = vmatpush.bf16.msra.mxu2 %v3196_v52  ;;  %v3233_v52 = vld [vmem:[#allocation5 + $0x5c8] sm:$0xff] }
  0xa3   :  { %1969 = vmatpush.bf16.msra.mxu3 %v3204_v53 }
  0xa4   :  { %1931 = vmatpush.bf16.msra.mxu0 %v3179_v54  ;;  %v3208_v54 = vld [vmem:[#allocation5 + $0x500] sm:$0xff] }
  0xa5   :  { %1944 = vmatpush.bf16.msra.mxu1 %v3187_v55 }
  0xa6   :  { %1957 = vmatpush.bf16.msra.mxu2 %v3195_v56  ;;  %v3216_v56 = vld [vmem:[#allocation5 + $0x540] sm:$0xff] }
  0xa7   :  { %1970 = vmatpush.bf16.msra.mxu3 %v3203_v57  ;;  %v3224_v57 = vld [vmem:[#allocation5 + $0x580] sm:$0xff] }
  0xa8   :  { %1932 = vmatpush.bf16.msra.mxu0 %v3178_v58  ;;  %v3232_v58 = vld [vmem:[#allocation5 + $0x5c0] sm:$0xff] }
  0xa9   :  { %1945 = vmatpush.bf16.msra.mxu1 %v3186_v59  ;;  %v127_v59 = vld.sshfl [vmem:[#allocation1 + $0x20] sm:$0xff pattern:$0x73625140] }
  0xaa   :  { %1958 = vmatpush.bf16.msra.mxu2 %v3194_v60  ;;  %v128_v60 = vld.sshfl [vmem:[#allocation1 + $0x28] sm:$0xff pattern:$0x73625140] }
  0xab   :  { %1971 = vmatpush.bf16.msra.mxu3 %v3202_v61  ;;  %v129_v61 = vld.sshfl [vmem:[#allocation1 + $0x30] sm:$0xff pattern:$0x73625140] }
  0xac   :  { %1933 = vmatpush.bf16.msra.mxu0 %v3177_v62  ;;  %v130_v62 = vld.sshfl [vmem:[#allocation1 + $0x38] sm:$0xff pattern:$0x73625140] }
  0xad   :  { %1946 = vmatpush.bf16.msra.mxu1 %v3185_v63  ;;  %v175_v63 = vpack.c.bf16 %v127_v59, %v127_v59 }
  0xae   :  { %1959 = vmatpush.bf16.msra.mxu2 %v3193_v0  ;;  %v176_v0 = vpack.c.bf16 %v128_v60, %v128_v60  ;;  %v3252_v60 = vld [vmem:[#allocation8 + $0x20] sm:$0xff] }
  0xaf   :  { %1972 = vmatpush.bf16.msra.mxu3 %v3201_v1  ;;  %v177_v1 = vpack.c.bf16 %v129_v61, %v129_v61 }
  0xb0   :  { %1934 = vmatpush.bf16.msra.mxu0 %v3176_v2  ;;  %v1728_v27 = vpop.f32.mrf.mxu0  ;;  %v178_v2 = vpack.c.bf16 %v130_v62, %v130_v62  ;;  %v3251_v62 = vld [vmem:[#allocation8 + $0x18] sm:$0xff] }
  0xb1   :  { %1947 = vmatpush.bf16.msra.mxu1 %v3184_v3  ;;  %v1729_v30 = vadd.f32 %v3263_v24, %v1728_v27  ;;  %v1741_v31 = vpop.f32.mrf.mxu1 }
  0xb2   :  { %1960 = vmatpush.bf16.msra.mxu2 %v3192_v4 }
  0xb3   :  { %1973 = vmatpush.bf16.msra.mxu3 %v3200_v5  ;;  %1935 = vmatmul.bf16.vlgmr.msra.gmra.mxu0 %v171_v14  ;;  %v1742_v34 = vadd.f32 %v1741_v31, %v1729_v30  ;;  %v3247_v31 = vld [vmem:[#allocation7 + $0x38] sm:$0xff] }
  0xb4   :  { %1979 = vmatpush.bf16.msrb.mxu0 %v3215_v6  ;;  %1948 = vmatmul.bf16.vlgmr.msra.gmra.mxu1 %v172_v16 }
  0xb5   :  { %1992 = vmatpush.bf16.msrb.mxu1 %v3223_v7  ;;  %1961 = vmatmul.bf16.vlgmr.msra.gmra.mxu2 %v173_v15 }
  0xb6   :  { %2005 = vmatpush.bf16.msrb.mxu2 %v3231_v12  ;;  %1974 = vmatmul.bf16.vlgmr.msra.gmra.mxu3 %v174_v17 }
  0xb7   :  { %2018 = vmatpush.bf16.msrb.mxu3 %v3239_v13 }
  0xb8   :  { %1980 = vmatpush.bf16.msrb.mxu0 %v3214_v18  ;;  %v1754_v39 = vpop.f32.mrf.mxu2  ;;  %v1730_v42 = vpop.f32.mrf.mxu0 }
  0xb9   :  { %1993 = vmatpush.bf16.msrb.mxu1 %v3222_v19  ;;  %v1755_v40 = vadd.f32 %v1754_v39, %v1742_v34  ;;  %v1767_v41 = vpop.f32.mrf.mxu3  ;;  %v1743_v46 = vpop.f32.mrf.mxu1  ;;  %v3246_v34 = vld [vmem:[#allocation7 + $0x30] sm:$0xff]  ;;  %v3243_v39 = vld [vmem:[#allocation7 + $0x18] sm:$0xff] }
  0xba   :  { %2006 = vmatpush.bf16.msrb.mxu2 %v3230_v20 }
  0xbb   :  { %2019 = vmatpush.bf16.msrb.mxu3 %v3238_v21  ;;  %v1768_v45 = vadd.f32 %v1767_v41, %v1755_v40  ;;  %v3242_v41 = vld [vmem:[#allocation7 + $0x10] sm:$0xff] }
  0xbc   :  { %1981 = vmatpush.bf16.msrb.mxu0 %v3213_v22 }
  0xbd   :  { %1994 = vmatpush.bf16.msrb.mxu1 %v3221_v23 }
  0xbe   :  { %2007 = vmatpush.bf16.msrb.mxu2 %v3229_v25 }
  0xbf   :  { %2020 = vmatpush.bf16.msrb.mxu3 %v3237_v26 }
  0xc0   :  { %1982 = vmatpush.bf16.msrb.mxu0 %v3212_v28  ;;  %v1756_v53 = vpop.f32.mrf.mxu2 }
  0xc1   :  { %1995 = vmatpush.bf16.msrb.mxu1 %v3220_v29  ;;  %v1769_v55 = vpop.f32.mrf.mxu3 }
  0xc2   :  { %2008 = vmatpush.bf16.msrb.mxu2 %v3228_v32  ;;  %v3254_v55 = vld [vmem:[#allocation8 + $0x30] sm:$0xff] }
  0xc3   :  { %2021 = vmatpush.bf16.msrb.mxu3 %v3236_v33 }
  0xc4   :  { %1983 = vmatpush.bf16.msrb.mxu0 %v3211_v35  ;;  %v3245_v35 = vld [vmem:[#allocation7 + $0x28] sm:$0xff] }
  0xc5   :  { %1996 = vmatpush.bf16.msrb.mxu1 %v3219_v36 }
  0xc6   :  { %2009 = vmatpush.bf16.msrb.mxu2 %v3227_v37 }
  0xc7   :  { %2022 = vmatpush.bf16.msrb.mxu3 %v3235_v38  ;;  %v3244_v38 = vld [vmem:[#allocation7 + $0x20] sm:$0xff] }
  0xc8   :  { %1984 = vmatpush.bf16.msrb.mxu0 %v3210_v43  ;;  %v3241_v43 = vld [vmem:[#allocation7 + $0x8] sm:$0xff] }
  0xc9   :  { %1997 = vmatpush.bf16.msrb.mxu1 %v3218_v44 }
  0xca   :  { %2010 = vmatpush.bf16.msrb.mxu2 %v3226_v47 }
  0xcb   :  { %2023 = vmatpush.bf16.msrb.mxu3 %v3234_v48  ;;  %v3240_v48 = vld [vmem:[#allocation7] sm:$0xff] }
  0xcc   :  { %1985 = vmatpush.bf16.msrb.mxu0 %v3209_v49 }
  0xcd   :  { %1998 = vmatpush.bf16.msrb.mxu1 %v3217_v50 }
  0xce   :  { %2011 = vmatpush.bf16.msrb.mxu2 %v3225_v51 }
  0xcf   :  { %2024 = vmatpush.bf16.msrb.mxu3 %v3233_v52  ;;  %v3255_v52 = vld [vmem:[#allocation8 + $0x38] sm:$0xff] }
  0xd0   :  { %1986 = vmatpush.bf16.msrb.mxu0 %v3208_v54  ;;  %v1780_v3 = vpop.f32.mrf.mxu0 }
  0xd1   :  { %1999 = vmatpush.bf16.msrb.mxu1 %v3216_v56  ;;  %v1781_v4 = vadd.f32 %v1780_v3, %v1768_v45  ;;  %v1793_v5 = vpop.f32.mrf.mxu1  ;;  %v3250_v3 = vld [vmem:[#allocation8 + $0x10] sm:$0xff] }
  0xd2   :  { %2012 = vmatpush.bf16.msrb.mxu2 %v3224_v57 }
  0xd3   :  { %2025 = vmatpush.bf16.msrb.mxu3 %v3232_v58  ;;  %1987 = vmatmul.bf16.vlgmr.msrb.gmra.mxu0 %v175_v63  ;;  %v1794_v6 = vadd.f32 %v1793_v5, %v1781_v4  ;;  %v3253_v58 = vld [vmem:[#allocation8 + $0x28] sm:$0xff] }
  0xd4   :  { %2000 = vmatmul.bf16.vlgmr.msrb.gmra.mxu1 %v176_v0  ;;  %2101 = vmatpush.bf16.msra.mxu0 %v3247_v31  ;;  %v3249_v5 = vld [vmem:[#allocation8 + $0x8] sm:$0xff] }
  0xd5   :  { %2013 = vmatmul.bf16.vlgmr.msrb.gmra.mxu2 %v177_v1  ;;  %2183 = vmatpush.bf16.msra.mxu1 %v3255_v52 }
  0xd6   :  { %2026 = vmatmul.bf16.vlgmr.msrb.gmra.mxu3 %v178_v2 }
  0xd8   :  { %v1806_v7 = vpop.f32.mrf.mxu2  ;;  %v1782_v10 = vpop.f32.mrf.mxu0  ;;  %2102 = vmatpush.bf16.msra.mxu0 %v3246_v34 }
  0xd9   :  { %v1807_v8 = vadd.f32 %v1806_v7, %v1794_v6  ;;  %v1819_v9 = vpop.f32.mrf.mxu3  ;;  %v1795_v12 = vpop.f32.mrf.mxu1  ;;  %2184 = vmatpush.bf16.msra.mxu1 %v3254_v55 }
  0xdb   :  { %v1820_v11 = vadd.f32 %v1819_v9, %v1807_v8 }
  0xdc   :  { %2103 = vmatpush.bf16.msra.mxu0 %v3245_v35 }
  0xdd   :  { %2185 = vmatpush.bf16.msra.mxu1 %v3253_v58 }
  0xe0   :  { %v1808_v13 = vpop.f32.mrf.mxu2  ;;  %2104 = vmatpush.bf16.msra.mxu0 %v3244_v38 }
  0xe1   :  { %v1821_v14 = vpop.f32.mrf.mxu3  ;;  %2186 = vmatpush.bf16.msra.mxu1 %v3252_v60 }
  0xe4   :  { %2105 = vmatpush.bf16.msra.mxu0 %v3243_v39 }
  0xe5   :  { %2187 = vmatpush.bf16.msra.mxu1 %v3251_v62 }
  0xe8   :  { %2106 = vmatpush.bf16.msra.mxu0 %v3242_v41 }
  0xe9   :  { %2188 = vmatpush.bf16.msra.mxu1 %v3250_v3 }
  0xec   :  { %2107 = vmatpush.bf16.msra.mxu0 %v3241_v43 }
  0xed   :  { %2189 = vmatpush.bf16.msra.mxu1 %v3249_v5 }
  0xf0   :  { %v1832_v15 = vpop.f32.mrf.mxu0  ;;  %2108 = vmatpush.bf16.msra.mxu0 %v3240_v48 }
  0xf1   :  { %v1833_v16 = vadd.f32 %v1832_v15, %v1820_v11  ;;  %v1845_v17 = vpop.f32.mrf.mxu1 }
  0xf3   :  { %v1846_v18 = vadd.f32 %v1845_v17, %v1833_v16  ;;  %v3248_v16 = vld [vmem:[#allocation8] sm:$0xff]  ;;  %v3264_v17 = vld [vmem:[%s3517_s4] ss:$0 sm:$0xff] }
  0xf4   :  { %2190 = vmatpush.bf16.msra.mxu1 %v3248_v16 }
  0xf8   :  { %v1858_v19 = vpop.f32.mrf.mxu2  ;;  %v1834_v22 = vpop.f32.mrf.mxu0 }
  0xf9   :  { %v1859_v20 = vadd.f32 %v1858_v19, %v1846_v18  ;;  %v1871_v21 = vpop.f32.mrf.mxu3  ;;  %v1847_v24 = vpop.f32.mrf.mxu1  ;;  %v3265_v22 = vld [vmem:[%s3519_s6] ss:$0 sm:$0xff] }
  0xfb   :  { %v1872_v23 = vadd.f32 %v1871_v21, %v1859_v20 }
 0x100   :  { %v1860_v25 = vpop.f32.mrf.mxu2 }
 0x101   :  { %v1873_v26 = vpop.f32.mrf.mxu3 }
 0x110   :  { %v1884_v27 = vpop.f32.mrf.mxu0 }
 0x111   :  { %v1897_v28 = vpop.f32.mrf.mxu1  ;;  %v1885_v45 = vadd.f32 %v1884_v27, %v1872_v23 }
 0x113   :  { %v1898_v50 = vadd.f32 %v1897_v28, %v1885_v45 }
 0x118   :  { %v1910_v29 = vpop.f32.mrf.mxu2  ;;  %v1886_v32 = vpop.f32.mrf.mxu0 }
 0x119   :  { %v1923_v30 = vpop.f32.mrf.mxu3  ;;  %v1899_v33 = vpop.f32.mrf.mxu1  ;;  %v1911_v51 = vadd.f32 %v1910_v29, %v1898_v50 }
 0x11b   :  { %v1924_v56 = vadd.f32 %v1923_v30, %v1911_v51 }
 0x120   :  { %v1912_v36 = vpop.f32.mrf.mxu2 }
 0x121   :  { %v1925_v37 = vpop.f32.mrf.mxu3 }
 0x130   :  { %v1936_v40 = vpop.f32.mrf.mxu0 }
 0x131   :  { %v1949_v42 = vpop.f32.mrf.mxu1  ;;  %v1937_v57 = vadd.f32 %v1936_v40, %v1924_v56 }
 0x133   :  { %v1950_v59 = vadd.f32 %v1949_v42, %v1937_v57 }
 0x138   :  { %v1962_v44 = vpop.f32.mrf.mxu2  ;;  %v1938_v47 = vpop.f32.mrf.mxu0 }
 0x139   :  { %v1975_v46 = vpop.f32.mrf.mxu3  ;;  %v1951_v49 = vpop.f32.mrf.mxu1  ;;  %v1963_v61 = vadd.f32 %v1962_v44, %v1950_v59 }
 0x13b   :  { %v1976_v63 = vadd.f32 %v1975_v46, %v1963_v61 }
 0x140   :  { %v1964_v53 = vpop.f32.mrf.mxu2 }
 0x141   :  { %v1977_v54 = vpop.f32.mrf.mxu3 }
 0x150   :  { %v1988_v0 = vpop.f32.mrf.mxu0 }
 0x151   :  { %v2001_v1 = vpop.f32.mrf.mxu1  ;;  %v1989_v2 = vadd.f32 %v1988_v0, %v1976_v63 }
 0x153   :  { %v2002_v4 = vadd.f32 %v2001_v1, %v1989_v2 }
 0x158   :  { %v2014_v6 = vpop.f32.mrf.mxu2  ;;  %v1990_v9 = vpop.f32.mrf.mxu0 }
 0x159   :  { %v2027_v7 = vpop.f32.mrf.mxu3  ;;  %v2015_v8 = vadd.f32 %v2014_v6, %v2002_v4  ;;  %v2003_v10 = vpop.f32.mrf.mxu1 }
 0x15b   :  { %v2028_v11 = vadd.f32 %v2027_v7, %v2015_v8 }
 0x15d   :  { %v2031_v12 = vmax.f32 %v2028_v11, 0.0 }
 0x15f   :  { %v2032_v13 = vpack.c.bf16 %v2031_v12, %v2031_v12 }
 0x160   :  { %v2016_v14 = vpop.f32.mrf.mxu2 }
 0x161   :  { %v2029_v15 = vpop.f32.mrf.mxu3  ;;  %2109 = vmatmul.bf16.vlgmr.msra.gmra.mxu0 %v2032_v13 }
 0x1de   :  { %v2110_v18 = vpop.f32.mrf.mxu0 }
 0x1df   :  { %v2111_v19 = vadd.f32 %v3264_v17, %v2110_v18 }
 0x1e1   :  { %v2114_v20 = vpack.c.bf16 %v2111_v19, %v2111_v19 }
 0x1e3   :  { %2191 = vmatmul.bf16.vlgmr.msra.gmra.mxu1 %v2114_v20 }
 0x1e6   :  { %v2112_v21 = vpop.f32.mrf.mxu0 }
 0x260   :  { %v2192_v23 = vpop.f32.mrf.mxu1 }
 0x261   :  { %v2193_v24 = vadd.f32 %v3265_v22, %v2192_v23 }
 0x263   :  { %2196 = vst [vmem:[#allocation10] sm:$0x3] %v2193_v24 }
 0x264   :  { %2207 = dma.vmem_to_hbm [thread:$0]  %s2203_s25, 32, %s2205_s28, [#allocation4]  }
 0x268   :  { %v2194_v25 = vpop.f32.mrf.mxu1 }
 0x269   :  { %3392 = dma.done.wait [#allocation4], 32  }
 0x26a   :  { %3393 = vsyncadd [#allocation4], 4294967264 }
 0x26b   :  { %2212 = vsyncpa [#allocation3], 1 }
 0x26c   :  { %2213 = vsyncpa [#allocation6], 1 }
 0x26d   :  { %2214 = vsyncpa [#allocation9], 1 }
 0x26e   :  { %2215 = vsyncpa [#allocation4], 1 }

</bundles_post_ra>
